<compile_context>
chip_gen: v7x
topology: tpu7x:2x2x1
jax: 0.10.0
libtpu: 0.0.40
codegen_flags: <defaults>
</compile_context>

<pallas_src>
import jax
import jax.numpy as jnp
from jax.experimental import pallas as pl
from jax.experimental.pallas import tpu as pltpu


# ----------------------------- kernel -----------------------------

def mlp_kernel(x_ref, w1_ref, b1_ref, w2_ref, b2_ref, w3_ref, b3_ref, out_ref):
    # x arrives as f32 straight from HBM; cast to bf16 in VMEM (single VPU pass).
    x = x_ref[...].astype(jnp.bfloat16)                         # (TB, 784) bf16

    # Layer 1: Linear(784 -> 128) + ReLU  (bf16 MXU inputs, f32 accumulation)
    h1 = jnp.dot(x, w1_ref[...], preferred_element_type=jnp.float32) + b1_ref[...]
    h1 = jnp.maximum(h1, 0.0).astype(jnp.bfloat16)

    # Layer 2: Linear(128 -> 64) + ReLU
    h2 = jnp.dot(h1, w2_ref[...], preferred_element_type=jnp.float32) + b2_ref[...]
    h2 = jnp.maximum(h2, 0.0).astype(jnp.bfloat16)

    # Layer 3: Linear(64 -> 10)
    logits = jnp.dot(h2, w3_ref[...], preferred_element_type=jnp.float32) + b3_ref[...]

    # LogSoftmax over dim=1 (numerically stable, f32, single pass)
    m = jnp.max(logits, axis=1, keepdims=True)
    z = logits - m
    lse = jnp.log(jnp.sum(jnp.exp(z), axis=1, keepdims=True))
    out_ref[...] = (z - lse).astype(out_ref.dtype)


# ----------------------------- wrapper -----------------------------

def _round_up(n, m):
    return ((n + m - 1) // m) * m


def _chip_config():
    """(tb_target, vmem_limit_bytes, min_grid_steps) chosen per chip generation."""
    try:
        vmem = pltpu.get_tpu_info().vmem_capacity_bytes
    except Exception:
        vmem = 128 * 1024 * 1024
    if vmem <= 64 * 1024 * 1024:
        # v7x-class: 64 MiB VMEM/TC, 3.2 TB/s HBM, 2 TensorCores -> big tiles AND >=8 grid
        # steps so the "parallel" batch axis is sharded across both cores.
        return 4096, 56 * 1024 * 1024, 8
    # v5e / v6e: 128 MiB VMEM, single TensorCore -> biggest tile that comfortably fits.
    return 8192, 100 * 1024 * 1024, 1


def prepare_params(params):
    """One-time pre-pack: (out,in) PyTorch weights -> (in,out) bf16; biases f32 rows."""
    return {
        "w1": jnp.asarray(params["w1"], jnp.float32).T.astype(jnp.bfloat16),  # (784,128)
        "w2": jnp.asarray(params["w2"], jnp.float32).T.astype(jnp.bfloat16),  # (128, 64)
        "w3": jnp.asarray(params["w3"], jnp.float32).T.astype(jnp.bfloat16),  # ( 64, 10)
        "b1": jnp.asarray(params["b1"], jnp.float32).reshape(1, -1),
        "b2": jnp.asarray(params["b2"], jnp.float32).reshape(1, -1),
        "b3": jnp.asarray(params["b3"], jnp.float32).reshape(1, -1),
    }


def net_forward(x, packed):
    """x: (B, 784) any float dtype. packed: prepare_params output. Returns (B, 10) f32."""
    B = x.shape[0]
    if B == 0:
        return jnp.zeros((0, 10), jnp.float32)

    tb_target, vmem_limit, min_steps = _chip_config()

    # Tile-size selection (no batch padding, no wrapper-side copies of x):
    #   * cap so multi-TC chips get at least `min_steps` grid steps,
    #   * if the whole batch fits one tile, use an exact (B, ...) block (always legal),
    #   * otherwise use a multiple-of-16 tile <= B and let the last block be ragged
    #     (Pallas masks the out-of-bounds rows on read and write).
    tb_cap = tb_target
    if min_steps > 1:
        tb_cap = min(tb_cap, max(16, _round_up(pl.cdiv(B, min_steps), 16)))
    if B <= tb_cap:
        TB = B
    else:
        TB = max(16, (tb_cap // 16) * 16)
    nb = pl.cdiv(B, TB)

    const2d = lambda i: (0, 0)             # weights/biases: VMEM-resident across steps

    out = pl.pallas_call(
        mlp_kernel,
        out_shape=jax.ShapeDtypeStruct((B, 10), jnp.float32),
        grid_spec=pltpu.PrefetchScalarGridSpec(
            num_scalar_prefetch=0,
            grid=(nb,),
            in_specs=[
                pl.BlockSpec((TB, 784), lambda i: (i, 0)),   # x tile (pipelined DMA, f32)
                pl.BlockSpec((784, 128), const2d),
                pl.BlockSpec((1, 128), const2d),
                pl.BlockSpec((128, 64), const2d),
                pl.BlockSpec((1, 64), const2d),
                pl.BlockSpec((64, 10), const2d),
                pl.BlockSpec((1, 10), const2d),
            ],
            out_specs=pl.BlockSpec((TB, 10), lambda i: (i, 0)),
        ),
        compiler_params=pltpu.CompilerParams(
            dimension_semantics=("parallel",),
            vmem_limit_bytes=vmem_limit,
        ),
    )(x.astype(jnp.float32), packed["w1"], packed["b1"], packed["w2"], packed["b2"],
      packed["w3"], packed["b3"])

    return out


# ----------------------------- test scaffolding -----------------------------

def init_params(key):
    """Deterministic synthetic parameters (PyTorch Linear layout: W is (out, in))."""
    ks = jax.random.split(key, 6)

    def lin(kw, kb, out_f, in_f):
        bound = 1.0 / jnp.sqrt(in_f)
        w = jax.random.uniform(kw, (out_f, in_f), jnp.float32, -bound, bound)
        b = jax.random.uniform(kb, (out_f,), jnp.float32, -bound, bound)
        return w, b

    w1, b1 = lin(ks[0], ks[1], 128, 784)
    w2, b2 = lin(ks[2], ks[3], 64, 128)
    w3, b3 = lin(ks[4], ks[5], 10, 64)
    return {"w1": w1, "b1": b1, "w2": w2, "b2": b2, "w3": w3, "b3": b3}


def reference_forward(x, p):
    """Pure-JAX reference matching the kernel's numerics (bf16 matmul inputs, f32 accum)."""
    xb = x.astype(jnp.bfloat16)
    w1 = p["w1"].T.astype(jnp.bfloat16)
    w2 = p["w2"].T.astype(jnp.bfloat16)
    w3 = p["w3"].T.astype(jnp.bfloat16)
    h1 = jnp.maximum(jnp.dot(xb, w1, preferred_element_type=jnp.float32) + p["b1"], 0.0)
    h1 = h1.astype(jnp.bfloat16)
    h2 = jnp.maximum(jnp.dot(h1, w2, preferred_element_type=jnp.float32) + p["b2"], 0.0)
    h2 = h2.astype(jnp.bfloat16)
    logits = jnp.dot(h2, w3, preferred_element_type=jnp.float32) + p["b3"]
    return jax.nn.log_softmax(logits, axis=1)


if __name__ == "__main__":
    key = jax.random.PRNGKey(0)
    kx, kp = jax.random.split(key)
    B = 8
    x = jax.random.normal(kx, (B, 784), jnp.float32)
    params = init_params(kp)

    packed = prepare_params(params)            # one-time weight pre-pack (bf16, (in,out))
    fwd = jax.jit(net_forward)

    out = fwd(x, packed)
    out = jax.block_until_ready(out)

    ref = reference_forward(x, params)
    assert out.shape == (B, 10)
    assert jnp.allclose(out, ref, atol=2e-2, rtol=2e-2), "mismatch vs. pure-JAX reference"
    print("KERNEL_OK")
</pallas_src>

<mosaic_0001>
module attributes {stable_mosaic.version = 11 : i64} {
  func.func @mlp_kernel(%arg0: i32, %arg1: memref<8x784xf32, #tpu.memory_space<vmem>>, %arg2: memref<784x128xbf16, #tpu.memory_space<vmem>>, %arg3: memref<1x128xf32, #tpu.memory_space<vmem>>, %arg4: memref<128x64xbf16, #tpu.memory_space<vmem>>, %arg5: memref<1x64xf32, #tpu.memory_space<vmem>>, %arg6: memref<64x10xbf16, #tpu.memory_space<vmem>>, %arg7: memref<1x10xf32, #tpu.memory_space<vmem>>, %arg8: memref<8x10xf32, #tpu.memory_space<vmem>>) attributes {dimension_semantics = [#tpu.dimension_semantics<parallel>], iteration_bounds = array<i64: 1>, scalar_prefetch = 0 : i64, scratch_operands = 0 : i64, tpu.core_type = #tpu.core_type<tc>, window_params = [{transform_indices = @transform_0, window_bounds = array<i64: 8, 784>}, {pipeline_mode = #tpu.pipeline_mode<synchronous>, transform_indices = @transform_1, window_bounds = array<i64: 784, 128>}, {pipeline_mode = #tpu.pipeline_mode<synchronous>, transform_indices = @transform_2, window_bounds = array<i64: 1, 128>}, {pipeline_mode = #tpu.pipeline_mode<synchronous>, transform_indices = @transform_3, window_bounds = array<i64: 128, 64>}, {pipeline_mode = #tpu.pipeline_mode<synchronous>, transform_indices = @transform_4, window_bounds = array<i64: 1, 64>}, {pipeline_mode = #tpu.pipeline_mode<synchronous>, transform_indices = @transform_5, window_bounds = array<i64: 64, 10>}, {pipeline_mode = #tpu.pipeline_mode<synchronous>, transform_indices = @transform_6, window_bounds = array<i64: 1, 10>}, {transform_indices = @transform_7, window_bounds = array<i64: 8, 10>}]} {
    %c0 = arith.constant 0 : index
    %c0_0 = arith.constant 0 : index
    %0 = vector.load %arg1[%c0, %c0_0] : memref<8x784xf32, #tpu.memory_space<vmem>>, vector<8x784xf32>
    %1 = arith.truncf %0 : vector<8x784xf32> to vector<8x784xbf16>
    %c0_1 = arith.constant 0 : index
    %c0_2 = arith.constant 0 : index
    %2 = vector.load %arg2[%c0_1, %c0_2] : memref<784x128xbf16, #tpu.memory_space<vmem>>, vector<784x128xbf16>
    %cst = arith.constant dense<0.000000e+00> : vector<8x128xf32>
    %3 = tpu.matmul %1, %2, %cst {dimension_numbers = #tpu.dot_dimension_numbers<[1], [0], [0], [1], [0, 0, 1, 1], [], []>} : vector<8x784xbf16>, vector<784x128xbf16>, vector<8x128xf32> -> vector<8x128xf32>
    %c0_3 = arith.constant 0 : index
    %c0_4 = arith.constant 0 : index
    %4 = vector.load %arg3[%c0_3, %c0_4] : memref<1x128xf32, #tpu.memory_space<vmem>>, vector<1x128xf32>
    %5 = vector.broadcast %4 : vector<1x128xf32> to vector<8x128xf32>
    %6 = arith.addf %3, %5 : vector<8x128xf32>
    %cst_5 = arith.constant 0.000000e+00 : f32
    %7 = vector.broadcast %cst_5 : f32 to vector<8x128xf32>
    %8 = arith.maximumf %6, %7 : vector<8x128xf32>
    %9 = arith.truncf %8 : vector<8x128xf32> to vector<8x128xbf16>
    %c0_6 = arith.constant 0 : index
    %c0_7 = arith.constant 0 : index
    %10 = vector.load %arg4[%c0_6, %c0_7] : memref<128x64xbf16, #tpu.memory_space<vmem>>, vector<128x64xbf16>
    %cst_8 = arith.constant dense<0.000000e+00> : vector<8x64xf32>
    %11 = tpu.matmul %9, %10, %cst_8 {dimension_numbers = #tpu.dot_dimension_numbers<[1], [0], [0], [1], [0, 0, 1, 1], [], []>} : vector<8x128xbf16>, vector<128x64xbf16>, vector<8x64xf32> -> vector<8x64xf32>
    %c0_9 = arith.constant 0 : index
    %c0_10 = arith.constant 0 : index
    %12 = vector.load %arg5[%c0_9, %c0_10] : memref<1x64xf32, #tpu.memory_space<vmem>>, vector<1x64xf32>
    %13 = vector.broadcast %12 : vector<1x64xf32> to vector<8x64xf32>
    %14 = arith.addf %11, %13 : vector<8x64xf32>
    %cst_11 = arith.constant 0.000000e+00 : f32
    %15 = vector.broadcast %cst_11 : f32 to vector<8x64xf32>
    %16 = arith.maximumf %14, %15 : vector<8x64xf32>
    %17 = arith.truncf %16 : vector<8x64xf32> to vector<8x64xbf16>
    %c0_12 = arith.constant 0 : index
    %c0_13 = arith.constant 0 : index
    %18 = vector.load %arg6[%c0_12, %c0_13] : memref<64x10xbf16, #tpu.memory_space<vmem>>, vector<64x10xbf16>
    %cst_14 = arith.constant dense<0.000000e+00> : vector<8x10xf32>
    %19 = tpu.matmul %17, %18, %cst_14 {dimension_numbers = #tpu.dot_dimension_numbers<[1], [0], [0], [1], [0, 0, 1, 1], [], []>} : vector<8x64xbf16>, vector<64x10xbf16>, vector<8x10xf32> -> vector<8x10xf32>
    %c0_15 = arith.constant 0 : index
    %c0_16 = arith.constant 0 : index
    %20 = vector.load %arg7[%c0_15, %c0_16] : memref<1x10xf32, #tpu.memory_space<vmem>>, vector<1x10xf32>
    %21 = vector.broadcast %20 : vector<1x10xf32> to vector<8x10xf32>
    %22 = arith.addf %19, %21 : vector<8x10xf32>
    %cst_17 = arith.constant dense<0xFF800000> : vector<8xf32>
    %23 = vector.multi_reduction <maximumf>, %22, %cst_17 [1] : vector<8x10xf32> to vector<8xf32>
    %24 = vector.shape_cast %23 : vector<8xf32> to vector<8x1xf32>
    %25 = vector.broadcast %24 : vector<8x1xf32> to vector<8x10xf32>
    %26 = arith.subf %22, %25 : vector<8x10xf32>
    %27 = math.exp %26 : vector<8x10xf32>
    %cst_18 = arith.constant dense<0.000000e+00> : vector<8xf32>
    %28 = vector.multi_reduction <add>, %27, %cst_18 [1] : vector<8x10xf32> to vector<8xf32>
    %29 = vector.shape_cast %28 : vector<8xf32> to vector<8x1xf32>
    %30 = math.log %29 : vector<8x1xf32>
    %31 = vector.broadcast %30 : vector<8x1xf32> to vector<8x10xf32>
    %32 = arith.subf %26, %31 : vector<8x10xf32>
    %c0_19 = arith.constant 0 : index
    %c0_20 = arith.constant 0 : index
    %33 = vector.load %arg8[%c0_19, %c0_20] : memref<8x10xf32, #tpu.memory_space<vmem>>, vector<8x10xf32>
    tpu.vector_store %arg8[%c0_19, %c0_20], %32 {strides = array<i32>} : memref<8x10xf32, #tpu.memory_space<vmem>>, vector<8x10xf32>,
    return
  }
  func.func @transform_0(%arg0: i32) -> (i32, i32) {
    %c0_i32 = arith.constant 0 : i32
    %c0_i32_0 = arith.constant 0 : i32
    return %arg0, %c0_i32 : i32, i32
  }
  func.func @transform_1(%arg0: i32) -> (i32, i32) {
    %c0_i32 = arith.constant 0 : i32
    %c0_i32_0 = arith.constant 0 : i32
    %c0_i32_1 = arith.constant 0 : i32
    return %c0_i32, %c0_i32_0 : i32, i32
  }
  func.func @transform_2(%arg0: i32) -> (i32, i32) {
    %c0_i32 = arith.constant 0 : i32
    %c0_i32_0 = arith.constant 0 : i32
    %c0_i32_1 = arith.constant 0 : i32
    return %c0_i32, %c0_i32_0 : i32, i32
  }
  func.func @transform_3(%arg0: i32) -> (i32, i32) {
    %c0_i32 = arith.constant 0 : i32
    %c0_i32_0 = arith.constant 0 : i32
    %c0_i32_1 = arith.constant 0 : i32
    return %c0_i32, %c0_i32_0 : i32, i32
  }
  func.func @transform_4(%arg0: i32) -> (i32, i32) {
    %c0_i32 = arith.constant 0 : i32
    %c0_i32_0 = arith.constant 0 : i32
    %c0_i32_1 = arith.constant 0 : i32
    return %c0_i32, %c0_i32_0 : i32, i32
  }
  func.func @transform_5(%arg0: i32) -> (i32, i32) {
    %c0_i32 = arith.constant 0 : i32
    %c0_i32_0 = arith.constant 0 : i32
    %c0_i32_1 = arith.constant 0 : i32
    return %c0_i32, %c0_i32_0 : i32, i32
  }
  func.func @transform_6(%arg0: i32) -> (i32, i32) {
    %c0_i32 = arith.constant 0 : i32
    %c0_i32_0 = arith.constant 0 : i32
    %c0_i32_1 = arith.constant 0 : i32
    return %c0_i32, %c0_i32_0 : i32, i32
  }
  func.func @transform_7(%arg0: i32) -> (i32, i32) {
    %c0_i32 = arith.constant 0 : i32
    %c0_i32_0 = arith.constant 0 : i32
    return %arg0, %c0_i32 : i32, i32
  }
}

</mosaic_0001>

<bundles_post_ra>
// kernel: net_forward.1
= control target key start
LH: loop header
LB: loop body
LE: loop exit
PB: predicated region body
PF: predicated region fallthrough
CT: control target
= control target key end

     0   :  { %12 = vsyncpa [#allocation3], 0  ;;  %s1550_s0 = inlined_call_operand.hbm [shape: f32[8,784], index: 0, kind: input, shape index: {}]   ;;  %s1551_s1 = inlined_call_operand.hbm [shape: bf16[784,128], index: 1, kind: input, shape index: {}]   ;;  %s1552_s2 = inlined_call_operand.hbm [shape: f32[1,128], index: 2, kind: input, shape index: {}]   ;;  %s1553_s3 = inlined_call_operand.hbm [shape: bf16[128,64], index: 3, kind: input, shape index: {}]   ;;  %s1554_s4 = inlined_call_operand.hbm [shape: f32[1,64], index: 4, kind: input, shape index: {}]   ;;  %s1555_s5 = inlined_call_operand.hbm [shape: bf16[64,10], index: 5, kind: input, shape index: {}]   ;;  %s1556_s6 = inlined_call_operand.hbm [shape: f32[1,10], index: 6, kind: input, shape index: {}]   ;;  %s1557_s7 = inlined_call_operand.hbm [shape: f32[8,10], index: 7, kind: output, shape index: {}]  }
   0x1   :  { %13 = vsyncpa [#allocation6], 0 }
   0x2   :  { %14 = vsyncpa [#allocation9], 0 }
   0x3   :  { %15 = vsyncpa [#allocation12], 0 }
   0x4   :  { %16 = vsyncpa [#allocation4], 0  ;;  %s1371_s24 = smov [#allocation5]   ;;  %s1185_s28 = scalar_lea.hbm %s1551_s1, 6272 }
   0x5   :  { %s32_s25 = sshll.u32 %s1371_s24, 4  ;;  %p1186_p0 = scmp.ne.s32.totalorder %s1551_s1, %s1185_s28  ;;  %s33_s25 = int_to_ptr.vmem [resolvable:$true] %s32_s25 }
   0x6   :  { %p1189_p1 = scmp.lt.u32.totalorder %s1185_s28, %s1551_s1 }
   0x8   :  { %p1191_p2 = pnand %p1189_p1, %p1186_p0 }
   0xa   :  { %1194 = shalt.err (!%p1191_p2)
}
   0xb   :  { %s1195_s10 = scalar_lea.vmem %s33_s25, 6272  ;;  %p1200_p4 = scmp.lt.s32.totalorder %s33_s25, %s33_s25 }
   0xc   :  { %p1196_p3 = scmp.ne.s32.totalorder %s33_s25, %s1195_s10  ;;  %p1201_p5 = scmp.lt.s32.totalorder %s1195_s10, %s1195_s10 }
   0xe   :  { %p1202_p6 = por %p1201_p5, %p1200_p4 }
  0x10   :  { %p1203_p7 = pnand %p1202_p6, %p1196_p3 }
  0x12   :  { %1206 = shalt.err (!%p1203_p7)
}
  0x13   :  { %s1372_s11 = smov 64   ;;  %s1373_s12 = smov 4  }
  0x14   :  { %38 = dma.hbm_to_vmem [thread:$0]  %s1551_s1, 6272, %s33_s25, [#allocation6], %s1372_s11, %s1372_s11, %s1373_s12  }
  0x15   :  { %s1374_s15 = smov [#allocation8]   ;;  %s1375_s17 = smov [#allocation11]  }
  0x16   :  { %s54_s16 = sshll.u32 %s1374_s15, 4  ;;  %s76_s18 = sshll.u32 %s1375_s17, 4  ;;  %s55_s16 = int_to_ptr.vmem [resolvable:$true] %s54_s16  ;;  %s77_s18 = int_to_ptr.vmem [resolvable:$true] %s76_s18 }
  0x17   :  { %s1207_s21 = scalar_lea.hbm %s1553_s3, 1024 }
  0x18   :  { %p1208_p8 = scmp.ne.s32.totalorder %s1553_s3, %s1207_s21  ;;  %p1211_p9 = scmp.lt.u32.totalorder %s1207_s21, %s1553_s3 }
  0x1a   :  { %p1213_p10 = pnand %p1211_p9, %p1208_p8 }
  0x1c   :  { %1216 = shalt.err (!%p1213_p10)
}
  0x1d   :  { %s1217_s1 = scalar_lea.vmem %s55_s16, 1024  ;;  %p1222_p12 = scmp.lt.s32.totalorder %s55_s16, %s55_s16 }
  0x1e   :  { %p1218_p11 = scmp.ne.s32.totalorder %s55_s16, %s1217_s1  ;;  %p1223_p13 = scmp.lt.s32.totalorder %s1217_s1, %s1217_s1 }
  0x20   :  { %p1224_p0 = por %p1223_p13, %p1222_p12 }
  0x22   :  { %p1225_p1 = pnand %p1224_p0, %p1218_p11 }
  0x24   :  { %1228 = shalt.err (!%p1225_p1)
}
  0x25   :  { %60 = dma.hbm_to_vmem [thread:$0]  %s1553_s3, 1024, %s55_s16, [#allocation9], %s1372_s11, %s1372_s11, %s1373_s12  }
  0x26   :  { %s1229_s30 = scalar_lea.hbm %s1555_s5, 512 }
  0x27   :  { %p1230_p2 = scmp.ne.s32.totalorder %s1555_s5, %s1229_s30  ;;  %p1233_p3 = scmp.lt.u32.totalorder %s1229_s30, %s1555_s5 }
  0x29   :  { %p1235_p4 = pnand %p1233_p3, %p1230_p2 }
  0x2b   :  { %1238 = shalt.err (!%p1235_p4)
}
  0x2c   :  { %s1239_s14 = scalar_lea.vmem %s77_s18, 512  ;;  %p1244_p6 = scmp.lt.s32.totalorder %s77_s18, %s77_s18 }
  0x2d   :  { %p1240_p5 = scmp.ne.s32.totalorder %s77_s18, %s1239_s14  ;;  %p1245_p7 = scmp.lt.s32.totalorder %s1239_s14, %s1239_s14 }
  0x2f   :  { %p1246_p8 = por %p1245_p7, %p1244_p6 }
  0x31   :  { %p1247_p9 = pnand %p1246_p8, %p1240_p5 }
  0x33   :  { %1250 = shalt.err (!%p1247_p9)
}
  0x34   :  { %82 = dma.hbm_to_vmem [thread:$0]  %s1555_s5, 512, %s77_s18, [#allocation12], %s1372_s11, %s1372_s11, %s1373_s12  }
  0x35   :  { %s1376_s16 = smov [#allocation2]   ;;  %s1377_s19 = smov [#allocation7]  }
  0x36   :  { %s23_s17 = sshll.u32 %s1376_s16, 4  ;;  %s45_s20 = sshll.u32 %s1377_s19, 4  ;;  %s24_s17 = int_to_ptr.vmem [resolvable:$true] %s23_s17  ;;  %s46_s20 = int_to_ptr.vmem [resolvable:$true] %s45_s20 }
  0x37   :  { %s1251_s23 = scalar_lea.hbm %s1550_s0, 896 }
  0x38   :  { %p1252_p10 = scmp.ne.s32.totalorder %s1550_s0, %s1251_s23  ;;  %p1255_p11 = scmp.lt.u32.totalorder %s1251_s23, %s1550_s0 }
  0x3a   :  { %p1257_p12 = pnand %p1255_p11, %p1252_p10 }
  0x3c   :  { %1260 = shalt.err (!%p1257_p12)
}
  0x3d   :  { %s1261_s5 = scalar_lea.vmem %s24_s17, 896  ;;  %p1266_p0 = scmp.lt.s32.totalorder %s24_s17, %s24_s17 }
  0x3e   :  { %p1262_p13 = scmp.ne.s32.totalorder %s24_s17, %s1261_s5  ;;  %p1267_p1 = scmp.lt.s32.totalorder %s1261_s5, %s1261_s5 }
  0x40   :  { %p1268_p2 = por %p1267_p1, %p1266_p0 }
  0x42   :  { %p1269_p3 = pnand %p1268_p2, %p1262_p13 }
  0x44   :  { %1272 = shalt.err (!%p1269_p3)
}
  0x45   :  { %26 = dma.hbm_to_vmem [thread:$0]  %s1550_s0, 896, %s24_s17, [#allocation3]  }
  0x46   :  { %s1273_s28 = scalar_lea.hbm %s1552_s2, 16 }
  0x47   :  { %p1274_p4 = scmp.ne.s32.totalorder %s1552_s2, %s1273_s28  ;;  %p1277_p5 = scmp.lt.u32.totalorder %s1273_s28, %s1552_s2 }
  0x49   :  { %p1279_p6 = pnand %p1277_p5, %p1274_p4 }
  0x4b   :  { %1282 = shalt.err (!%p1279_p6)
}
  0x4c   :  { %s1283_s10 = scalar_lea.vmem %s46_s20, 16  ;;  %s1287_s13 = scalar_lea.vmem %s46_s20, 32 }
  0x4d   :  { %p1284_p7 = scmp.ne.s32.totalorder %s46_s20, %s1283_s10  ;;  %p1288_p8 = scmp.lt.s32.totalorder %s46_s20, %s46_s20 }
  0x4e   :  { %p1289_p9 = scmp.lt.s32.totalorder %s1287_s13, %s1283_s10 }
  0x50   :  { %p1290_p10 = por %p1289_p9, %p1288_p8 }
  0x52   :  { %p1291_p11 = pnand %p1290_p10, %p1284_p7 }
  0x54   :  { %1294 = shalt.err (!%p1291_p11)
}
  0x55   :  { %48 = dma.hbm_to_vmem [thread:$0]  %s1552_s2, 16, %s46_s20, [#allocation6]  }
  0x56   :  { %s1378_s3 = smov [#allocation10]   ;;  %s1379_s16 = smov [#allocation13]  }
  0x57   :  { %s67_s15 = sshll.u32 %s1378_s3, 4  ;;  %s89_s17 = sshll.u32 %s1379_s16, 4  ;;  %s68_s15 = int_to_ptr.vmem [resolvable:$true] %s67_s15  ;;  %s90_s17 = int_to_ptr.vmem [resolvable:$true] %s89_s17 }
  0x58   :  { %s1295_s22 = scalar_lea.hbm %s1554_s4, 16 }
  0x59   :  { %p1296_p12 = scmp.ne.s32.totalorder %s1554_s4, %s1295_s22  ;;  %p1299_p13 = scmp.lt.u32.totalorder %s1295_s22, %s1554_s4 }
  0x5b   :  { %p1301_p0 = pnand %p1299_p13, %p1296_p12 }
  0x5d   :  { %1304 = shalt.err (!%p1301_p0)
}
  0x5e   :  { %s1305_s2 = scalar_lea.vmem %s68_s15, 16  ;;  %s1309_s20 = scalar_lea.vmem %s68_s15, 32 }
  0x5f   :  { %p1306_p1 = scmp.ne.s32.totalorder %s68_s15, %s1305_s2  ;;  %p1310_p2 = scmp.lt.s32.totalorder %s68_s15, %s68_s15 }
  0x60   :  { %p1311_p3 = scmp.lt.s32.totalorder %s1309_s20, %s1305_s2 }
  0x62   :  { %p1312_p4 = por %p1311_p3, %p1310_p2 }
  0x64   :  { %p1313_p5 = pnand %p1312_p4, %p1306_p1 }
  0x66   :  { %1316 = shalt.err (!%p1313_p5)
}
  0x67   :  { %70 = dma.hbm_to_vmem [thread:$0]  %s1554_s4, 16, %s68_s15, [#allocation9]  }
  0x68   :  { %s1317_s18 = scalar_lea.hbm %s1556_s6, 16 }
  0x69   :  { %p1318_p6 = scmp.ne.s32.totalorder %s1556_s6, %s1317_s18  ;;  %p1321_p7 = scmp.lt.u32.totalorder %s1317_s18, %s1556_s6 }
  0x6b   :  { %p1323_p8 = pnand %p1321_p7, %p1318_p6 }
  0x6d   :  { %1326 = shalt.err (!%p1323_p8)
}
  0x6e   :  { %s1327_s8 = scalar_lea.vmem %s90_s17, 16  ;;  %s1331_s9 = scalar_lea.vmem %s90_s17, 32 }
  0x6f   :  { %p1328_p9 = scmp.ne.s32.totalorder %s90_s17, %s1327_s8  ;;  %p1332_p10 = scmp.lt.s32.totalorder %s90_s17, %s90_s17 }
  0x70   :  { %p1333_p11 = scmp.lt.s32.totalorder %s1331_s9, %s1327_s8 }
  0x72   :  { %p1334_p12 = por %p1333_p11, %p1332_p10 }
  0x74   :  { %p1335_p13 = pnand %p1334_p12, %p1328_p9 }
  0x76   :  { %1338 = shalt.err (!%p1335_p13)
}
  0x77   :  { %92 = dma.hbm_to_vmem [thread:$0]  %s1556_s6, 16, %s90_s17, [#allocation12]  }
  0x78   :  { %1361 = dma.done.wait [#allocation3], 896  }
  0x79   :  { %1362 = vsyncadd [#allocation3], 4294966400 }
  0x7a   :  { %1363 = dma.done.wait [#allocation6], 6288  }
  0x7b   :  { %1364 = vsyncadd [#allocation6], 4294961008 }
  0x7c   :  { %1365 = dma.done.wait [#allocation9], 1040  }
  0x7d   :  { %1366 = vsyncadd [#allocation9], 4294966256 }
  0x7e   :  { %1367 = dma.done.wait [#allocation12], 528  }
  0x7f   :  { %1368 = vsyncadd [#allocation12], 4294966768  ;;  %v1120_v0 = vld [vmem:[#allocation5 + $0x40] sm:$0xff]   ;;  %v1124_v4 = vld [vmem:[#allocation5 + $0x48] sm:$0xff]   ;;  %v1380_v44 = vmov 0.0   ;;  %vm1381_vm0 = vmmov 0  }
  0x80   :  { %v1121_v1 = vld [vmem:[#allocation5] sm:$0xff]   ;;  %988 = vmatprep.subr.bf16.mxu0 %v1120_v0  ;;  %v1125_v5 = vld [vmem:[#allocation5 + $0x8] sm:$0xff]   ;;  %v1128_v8 = vld [vmem:[#allocation5 + $0x50] sm:$0xff]   ;;  %vm528_vm1 = vcmask 130048   ;;  %vm846_vm2 = vcmask 523264   ;;  %vm890_vm3 = vcmask 80896  }
  0x81   :  { %v1122_v2 = vld [vmem:[#allocation5 + $0xc0] sm:$0xff]   ;;  %989 = vmatpush3.bf16.msra.mxu0 %v1121_v1  ;;  %v1126_v6 = vld [vmem:[#allocation5 + $0xc8] sm:$0xff]   ;;  %v1129_v9 = vld [vmem:[#allocation5 + $0x10] sm:$0xff]   ;;  %s1382_s6 = smov [#allocation14]  }
  0x82   :  { %v1123_v3 = vld [vmem:[#allocation5 + $0x80] sm:$0xff]   ;;  %1010 = vmatprep.subr.bf16.mxu1 %v1122_v2  ;;  %990 = vmatprep.subr.bf16.mxu0 %v1124_v4  ;;  %v1127_v7 = vld [vmem:[#allocation5 + $0x88] sm:$0xff]   ;;  %v1130_v10 = vld [vmem:[#allocation5 + $0xd0] sm:$0xff]   ;;  %s910_s13 = sshll.u32 %s1382_s6, 4  ;;  %s911_s13 = int_to_ptr.vmem [resolvable:$true] %s910_s13 }
  0x83   :  { %1011 = vmatpush3.bf16.msra.mxu1 %v1123_v3  ;;  %v1131_v11 = vld [vmem:[#allocation5 + $0x90] sm:$0xff]   ;;  %v1132_v12 = vld [vmem:[#allocation5 + $0x58] sm:$0xff]   ;;  %v1136_v16 = vld [vmem:[#allocation5 + $0x60] sm:$0xff]   ;;  %s1339_s0 = scalar_lea.vmem %s911_s13, 128  ;;  %p1344_p1 = scmp.lt.s32.totalorder %s911_s13, %s911_s13 }
  0x84   :  { %1012 = vmatprep.subr.bf16.mxu1 %v1126_v6  ;;  %v1133_v13 = vld [vmem:[#allocation5 + $0x18] sm:$0xff]   ;;  %v1137_v17 = vld [vmem:[#allocation5 + $0x20] sm:$0xff]   ;;  %v1140_v20 = vld [vmem:[#allocation5 + $0x68] sm:$0xff]   ;;  %p1340_p0 = scmp.ne.s32.totalorder %s911_s13, %s1339_s0  ;;  %p1345_p2 = scmp.lt.s32.totalorder %s1339_s0, %s1339_s0 }
  0x85   :  { %991 = vmatpush3.bf16.msra.mxu0 %v1125_v5  ;;  %v1134_v14 = vld [vmem:[#allocation5 + $0xd8] sm:$0xff]   ;;  %v1138_v18 = vld [vmem:[#allocation5 + $0xe0] sm:$0xff]   ;;  %v1141_v21 = vld [vmem:[#allocation5 + $0x28] sm:$0xff]  }
  0x86   :  { %992 = vmatprep.subr.bf16.mxu0 %v1128_v8  ;;  %v1135_v15 = vld [vmem:[#allocation5 + $0x98] sm:$0xff]   ;;  %v1139_v19 = vld [vmem:[#allocation5 + $0xa0] sm:$0xff]   ;;  %v1142_v22 = vld [vmem:[#allocation5 + $0xe8] sm:$0xff]   ;;  %p1346_p3 = por %p1345_p2, %p1344_p1 }
  0x87   :  { %1013 = vmatpush3.bf16.msra.mxu1 %v1127_v7  ;;  %v1143_v23 = vld [vmem:[#allocation5 + $0xa8] sm:$0xff]   ;;  %v1144_v24 = vld [vmem:[#allocation5 + $0x70] sm:$0xff]   ;;  %v1148_v28 = vld [vmem:[#allocation5 + $0x78] sm:$0xff]  }
  0x88   :  { %1014 = vmatprep.subr.bf16.mxu1 %v1130_v10  ;;  %v1145_v25 = vld [vmem:[#allocation5 + $0x30] sm:$0xff]   ;;  %v1149_v29 = vld [vmem:[#allocation5 + $0x38] sm:$0xff]   ;;  %v115_v34 = vld [vmem:[#allocation2] sm:$0xff]  ;;  %p1347_p4 = pnand %p1346_p3, %p1340_p0 }
  0x89   :  { %993 = vmatpush3.bf16.msra.mxu0 %v1129_v9  ;;  %v1146_v26 = vld [vmem:[#allocation5 + $0xf0] sm:$0xff]   ;;  %v1150_v30 = vld [vmem:[#allocation5 + $0xf8] sm:$0xff]   ;;  %v122_v35 = vpack.c.bf16 %v115_v34, %v115_v34  ;;  %v1152_v36 = vld [vmem:[#allocation5 + $0x140] sm:$0xff]  }
  0x8a   :  { %994 = vmatprep.subr.bf16.mxu0 %v1132_v12  ;;  %v1147_v27 = vld [vmem:[#allocation5 + $0xb0] sm:$0xff]   ;;  %v1151_v33 = vld [vmem:[#allocation5 + $0xb8] sm:$0xff]   ;;  %v118_v37 = vld [vmem:[#allocation2 + $0x18] sm:$0xff] }
  0x8b   :  { %1015 = vmatpush3.bf16.msra.mxu1 %v1131_v11  ;;  %v116_v31 = vld [vmem:[#allocation2 + $0x8] sm:$0xff]  ;;  %v125_v38 = vpack.c.bf16 %v118_v37, %v118_v37  ;;  %v1153_v39 = vld [vmem:[#allocation5 + $0x100] sm:$0xff]   ;;  %v117_v40 = vld [vmem:[#allocation2 + $0x10] sm:$0xff] }
  0x8c   :  { %1016 = vmatprep.subr.bf16.mxu1 %v1134_v14  ;;  %v123_v32 = vpack.c.bf16 %v116_v31, %v116_v31  ;;  %v124_v41 = vpack.c.bf16 %v117_v40, %v117_v40  ;;  %v1154_v42 = vld [vmem:[#allocation5 + $0x148] sm:$0xff]   ;;  %v1156_v45 = vld [vmem:[#allocation5 + $0x150] sm:$0xff]   ;;  %v1158_v47 = vld [vmem:[#allocation5 + $0x158] sm:$0xff]  }
  0x8d   :  { %995 = vmatpush3.bf16.msra.mxu0 %v1133_v13  ;;  %604 = vmatprep.mubr.bf16.mxu1 %v125_v38  ;;  %v1155_v43 = vld [vmem:[#allocation5 + $0x108] sm:$0xff]   ;;  %v1157_v46 = vld [vmem:[#allocation5 + $0x110] sm:$0xff]   ;;  %v1159_v48 = vld [vmem:[#allocation5 + $0x118] sm:$0xff]  }
  0x8e   :  { %996 = vmatprep.subr.bf16.mxu0 %v1136_v16  ;;  %564 = vmatprep.mubr.bf16.mxu0 %v123_v32  ;;  %v1160_v49 = vld [vmem:[#allocation5 + $0x160] sm:$0xff]   ;;  %v1162_v51 = vld [vmem:[#allocation5 + $0x168] sm:$0xff]   ;;  %v120_v54 = vld [vmem:[#allocation2 + $0x28] sm:$0xff] }
  0x8f   :  { %1017 = vmatpush3.bf16.msra.mxu1 %v1135_v15  ;;  %v1161_v50 = vld [vmem:[#allocation5 + $0x120] sm:$0xff]   ;;  %v1163_v52 = vld [vmem:[#allocation5 + $0x128] sm:$0xff]   ;;  %v1164_v55 = vld [vmem:[#allocation5 + $0x170] sm:$0xff]   ;;  %v127_v56 = vpack.c.bf16 %v120_v54, %v120_v54 }
  0x90   :  { %1018 = vmatprep.subr.bf16.mxu1 %v1138_v18  ;;  %v1168_v53 = vld [vmem:[#allocation5 + $0x180] sm:$0xff]   ;;  %v121_v57 = vld [vmem:[#allocation2 + $0x30] sm:$0xff]  ;;  %v1165_v59 = vld [vmem:[#allocation5 + $0x130] sm:$0xff]  }
  0x91   :  { %997 = vmatpush3.bf16.msra.mxu0 %v1137_v17  ;;  %v128_v58 = vpack.c.bf16 %v121_v57, %v121_v57  ;;  %v1166_v60 = vld [vmem:[#allocation5 + $0x178] sm:$0xff]   ;;  %v119_v62 = vld [vmem:[#allocation2 + $0x20] sm:$0xff] }
  0x92   :  { %998 = vmatprep.subr.bf16.mxu0 %v1140_v20  ;;  %v1167_v61 = vld [vmem:[#allocation5 + $0x138] sm:$0xff]   ;;  %v126_v63 = vpack.c.bf16 %v119_v62, %v119_v62  ;;  %v1169_v0 = vld [vmem:[#allocation8] sm:$0xff]   ;;  %v1172_v3 = vld [vmem:[#allocation8 + $0x18] sm:$0xff]  }
  0x93   :  { %1019 = vmatpush3.bf16.msra.mxu1 %v1139_v19  ;;  %v1170_v1 = vld [vmem:[#allocation8 + $0x8] sm:$0xff]   ;;  %v1171_v2 = vld [vmem:[#allocation8 + $0x10] sm:$0xff]   ;;  %v1173_v4 = vld [vmem:[#allocation8 + $0x20] sm:$0xff]  }
  0x94   :  { %1020 = vmatprep.subr.bf16.mxu1 %v1142_v22  ;;  %v1174_v5 = vld [vmem:[#allocation8 + $0x28] sm:$0xff]   ;;  %v1175_v6 = vld [vmem:[#allocation8 + $0x30] sm:$0xff]   ;;  %v1176_v7 = vld [vmem:[#allocation8 + $0x38] sm:$0xff]  }
  0x95   :  { %999 = vmatpush3.bf16.msra.mxu0 %v1141_v21  ;;  %v1177_v8 = vld [vmem:[#allocation11] sm:$0xff]   ;;  %v1178_v9 = vld [vmem:[#allocation11 + $0x8] sm:$0xff]   ;;  %v922_v11 = vld [vmem:[#allocation7] ss:$0 sm:$0xff] }
  0x96   :  { %1000 = vmatprep.subr.bf16.mxu0 %v1144_v24  ;;  %v1180_v37 = vld [vmem:[#allocation11 + $0x18] sm:$0xff]  }
  0x97   :  { %1021 = vmatpush3.bf16.msra.mxu1 %v1143_v23  ;;  %v973_v38 = vld [vmem:[#allocation10] ss:$0 sm:$0xff] }
  0x98   :  { %1022 = vmatprep.subr.bf16.mxu1 %v1146_v26 }
  0x99   :  { %1001 = vmatpush3.bf16.msra.mxu0 %v1145_v25 }
  0x9a   :  { %1002 = vmatprep.subr.bf16.mxu0 %v1148_v28 }
  0x9b   :  { %1023 = vmatpush3.bf16.msra.mxu1 %v1147_v27 }
  0x9c   :  { %1024 = vmatprep.subr.bf16.mxu1 %v1150_v30 }
  0x9d   :  { %1003 = vmatpush3.bf16.msra.mxu0 %v1149_v29 }
  0x9e   :  { %1032 = vmatprep.subr.bf16.mxu0 %v1152_v36  ;;  %v1179_v36 = vld [vmem:[#allocation11 + $0x10] sm:$0xff]  }
  0x9f   :  { %1025 = vmatpush3.bf16.msra.mxu1 %v1151_v33 }
  0xa0   :  { %565 = vmatmul.mubr.bf16.vlgmr.msra.gmra.mrb[0].mxu0 %v122_v35  ;;  %1070 = vmatprep.subr.bf16.mxu1 %v1380_v44 }
  0xa1   :  { %1033 = vmatpush3.bf16.msra.mxu0 %v1153_v39  ;;  %644 = vmatprep.mubr.bf16.mxu0 %v127_v56 }
  0xa2   :  { %605 = vmatmul.mubr.bf16.vlgmr.msra.gmra.mrb[0].mxu1 %v124_v41  ;;  %1034 = vmatprep.subr.bf16.mxu0 %v1154_v42 }
  0xa3   :  { %1072 = vmatprep.mubr.msk.bf16.mxu1 %vm1381_vm0, %v1380_v44  ;;  %1071 = vmatpush3.bf16.msra.mxu1 %v1168_v53 }
  0xa4   :  { %1076 = vmatprep.subr.bf16.mxu1 %v1380_v44 }
  0xa5   :  { %1035 = vmatpush3.bf16.msra.mxu0 %v1155_v43 }
  0xa6   :  { %1036 = vmatprep.subr.bf16.mxu0 %v1156_v45 }
  0xa9   :  { %1037 = vmatpush3.bf16.msra.mxu0 %v1157_v46 }
  0xaa   :  { %1038 = vmatprep.subr.bf16.mxu0 %v1158_v47  ;;  %1073 = vmatmul.mubr.msk.bf16.vlgmr.msra.gmra.mrb[4].mxu1 %vm528_vm1, %v128_v58  ;;  %v982_v47 = vld [vmem:[#allocation13] ss:$0 sm:$0xff] }
  0xab   :  { %1092 = vmatprep.mubr.msk.bf16.mxu1 %vm1381_vm0, %v1380_v44  ;;  %1077 = vmatpush3.bf16.msra.mxu1 %v1169_v0 }
  0xac   :  { %1078 = vmatprep.subr.bf16.mxu1 %v1380_v44 }
  0xad   :  { %1039 = vmatpush3.bf16.msra.mxu0 %v1159_v48 }
  0xae   :  { %1040 = vmatprep.subr.bf16.mxu0 %v1160_v49 }
  0xaf   :  { %1079 = vmatpush3.bf16.msra.mxu1 %v1170_v1 }
  0xb0   :  { %1080 = vmatprep.subr.bf16.mxu1 %v1380_v44 }
  0xb1   :  { %1041 = vmatpush3.bf16.msra.mxu0 %v1161_v50 }
  0xb2   :  { %1042 = vmatprep.subr.bf16.mxu0 %v1162_v51 }
  0xb3   :  { %1081 = vmatpush3.bf16.msra.mxu1 %v1171_v2 }
  0xb4   :  { %1082 = vmatprep.subr.bf16.mxu1 %v1380_v44 }
  0xb5   :  { %1043 = vmatpush3.bf16.msra.mxu0 %v1163_v52 }
  0xb6   :  { %1044 = vmatprep.subr.bf16.mxu0 %v1164_v55 }
  0xb7   :  { %1083 = vmatpush3.bf16.msra.mxu1 %v1172_v3 }
  0xb8   :  { %1084 = vmatprep.subr.bf16.mxu1 %v1380_v44 }
  0xb9   :  { %1045 = vmatpush3.bf16.msra.mxu0 %v1165_v59 }
  0xba   :  { %1046 = vmatprep.subr.bf16.mxu0 %v1166_v60 }
  0xbb   :  { %1085 = vmatpush3.bf16.msra.mxu1 %v1173_v4 }
  0xbc   :  { %1086 = vmatprep.subr.bf16.mxu1 %v1380_v44 }
  0xbd   :  { %1047 = vmatpush3.bf16.msra.mxu0 %v1167_v61 }
  0xbe   :  { %1096 = vmatprep.subr.bf16.mxu0 %v1380_v44 }
  0xbf   :  { %1087 = vmatpush3.bf16.msra.mxu1 %v1174_v5 }
  0xc0   :  { %645 = vmatmul.mubr.bf16.vlgmr.msra.gmra.mrb[4].mxu0 %v126_v63  ;;  %1088 = vmatprep.subr.bf16.mxu1 %v1380_v44 }
  0xc1   :  { %1104 = vmatprep.mubr.msk.bf16.mxu0 %vm1381_vm0, %v1380_v44  ;;  %1097 = vmatpush3.bf16.msra.mxu0 %v1177_v8 }
  0xc2   :  { %1098 = vmatprep.subr.bf16.mxu0 %v1380_v44 }
  0xc3   :  { %1089 = vmatpush3.bf16.msra.mxu1 %v1175_v6 }
  0xc4   :  { %1090 = vmatprep.subr.bf16.mxu1 %v1380_v44 }
  0xc5   :  { %1099 = vmatpush3.bf16.msra.mxu0 %v1178_v9 }
  0xc6   :  { %1100 = vmatprep.subr.bf16.mxu0 %v1380_v44 }
  0xc7   :  { %1091 = vmatpush3.bf16.msra.mxu1 %v1176_v7 }
  0xc9   :  { %1101 = vmatpush3.bf16.msra.mxu0 %v1179_v36 }
  0xca   :  { %1102 = vmatprep.subr.bf16.mxu0 %v1380_v44 }
  0xcd   :  { %1103 = vmatpush3.bf16.msra.mxu0 %v1180_v37 }
 0x173   :  { %v1004_v10 = vpop.f32.mrb[0].mxu0 }
 0x174   :  { %v1005_v12 = vpop.f32.mrb[1].mxu0 }
 0x175   :  { %v1006_v13 = vadd.f32 %v1005_v12, %v1004_v10  ;;  %v1007_v14 = vpop.f32.mrb[2].mxu0  ;;  %v1026_v15 = vpop.f32.mrb[0].mxu1 }
 0x176   :  { %v1008_v16 = vpop.f32.mrb[3].mxu0  ;;  %v1027_v18 = vpop.f32.mrb[1].mxu1 }
 0x177   :  { %v567_v17 = vadd.f32 %v1006_v13, %v922_v11  ;;  %v1028_v19 = vadd.f32 %v1027_v18, %v1026_v15  ;;  %v1029_v20 = vpop.f32.mrb[2].mxu1 }
 0x178   :  { %v1030_v21 = vpop.f32.mrb[3].mxu1 }
 0x179   :  { %v607_v22 = vadd.f32 %v1028_v19, %v567_v17 }
 0x17d   :  { %v686_v23 = vpop.f32.mrb[4].mxu1 }
 0x17e   :  { %v1074_v24 = vpop.f32.mrb[5].mxu1 }
 0x17f   :  { %v689_v25 = vpop.f32.mrb[6].mxu1 }
 0x180   :  { %v1075_v26 = vpop.f32.mrb[7].mxu1 }
 0x193   :  { %v1048_v27 = vpop.f32.mrb[4].mxu0 }
 0x194   :  { %v1049_v28 = vpop.f32.mrb[5].mxu0 }
 0x195   :  { %v1050_v29 = vadd.f32 %v1049_v28, %v1048_v27  ;;  %v1051_v30 = vpop.f32.mrb[6].mxu0 }
 0x196   :  { %v1052_v31 = vpop.f32.mrb[7].mxu0 }
 0x197   :  { %v647_v32 = vadd.f32 %v1050_v29, %v607_v22 }
 0x199   :  { %v687_v33 = vadd.f32 %v686_v23, %v647_v32 }
 0x19b   :  { %v692_v34 = vmax.f32 %v687_v33, 0.0 }
 0x19d   :  { %v693_v35 = vpack.c.bf16 %v692_v34, %v692_v34 }
 0x19f   :  { %1093 = vmatmul.mubr.bf16.vlgmr.msra.gmra.mrb[8].mxu1 %v693_v35 }
 0x272   :  { %v799_v39 = vpop.f32.mrb[8].mxu1 }
 0x273   :  { %v800_v40 = vadd.f32 %v973_v38, %v799_v39  ;;  %v1094_v41 = vpop.f32.mrb[9].mxu1 }
 0x274   :  { %v802_v42 = vpop.f32.mrb[10].mxu1 }
 0x275   :  { %v805_v43 = vmax.f32 %v800_v40, 0.0  ;;  %v1095_v45 = vpop.f32.mrb[11].mxu1 }
 0x277   :  { %v806_v46 = vpack.c.bf16 %v805_v43, %v805_v43 }
 0x279   :  { %1105 = vmatmul.mubr.msk.bf16.vlgmr.msra.gmra.mrb[8].mxu0 %vm846_vm2, %v806_v46 }
 0x34c   :  { %v884_v48 = vpop.f32.mrb[8].mxu0 }
 0x34d   :  { %v885_v49 = vadd.f32 %v982_v47, %v884_v48  ;;  %v1106_v50 = vpop.f32.mrb[9].mxu0 }
 0x34e   :  { %v887_v51 = vpop.f32.mrb[10].mxu0 }
 0x34f   :  { %v1107_v52 = vpop.f32.mrb[11].mxu0  ;;  %v891_v44 = vsel %vm890_vm3, %v885_v49, -inf }
 0x350   :  { %892 = vmax.xlane.f32.xlu0 %v891_v44 }
 0x3dd   :  { %v893_v53 = vpop.xlane.xlu0 %892 }
 0x3de   :  { %v894_v54 = vsub.f32 %v885_v49, %v893_v53 }
 0x3e0   :  { %v895_v55 = vmul.f32 1.442695, %v894_v54 }
 0x3e2   :  { %1181 = vpow2.f32 %v895_v55 }
 0x3ec   :  { %v1182_v56 = vpop.eup %1181 }
 0x3ed   :  { %v897_v57 = vsel %vm890_vm3, %v1182_v56, 0.0 }
 0x3ee   :  { %898 = vadd.xlane.f32.xlu0 %v897_v57 }
 0x47b   :  { %v899_v58 = vpop.xlane.xlu0 %898 }
 0x47c   :  { %1183 = vlog2.f32 %v899_v58 }
 0x486   :  { %v1184_v59 = vpop.eup %1183 }
 0x487   :  { %v901_v60 = vmul.f32 0.6931472, %v1184_v59 }
 0x489   :  { %v902_v61 = vsub.f32 %v894_v54, %v901_v60 }
 0x48b   :  { %903 = vst.msk [vmem:[#allocation14] sm:$0xff] %vm890_vm3, %v902_v61 }
 0x48c   :  { %1350 = shalt.err (!%p1347_p4)
}
 0x48d   :  { %s1351_s15 = scalar_lea.hbm %s1557_s7, 128 }
 0x48e   :  { %p1352_p5 = scmp.ne.s32.totalorder %s1557_s7, %s1351_s15  ;;  %p1355_p6 = scmp.lt.u32.totalorder %s1351_s15, %s1557_s7 }
 0x490   :  { %p1357_p7 = pnand %p1355_p6, %p1352_p5 }
 0x492   :  { %1360 = shalt.err (!%p1357_p7)
}
 0x493   :  { %913 = dma.vmem_to_hbm [thread:$0]  %s911_s13, 128, %s1557_s7, [#allocation4]  }
 0x494   :  { %1369 = dma.done.wait [#allocation4], 128  }
 0x495   :  { %1370 = vsyncadd [#allocation4], 4294967168 }
 0x496   :  { %917 = vsyncpa [#allocation3], 1 }
 0x497   :  { %918 = vsyncpa [#allocation6], 1 }
 0x498   :  { %919 = vsyncpa [#allocation9], 1 }
 0x499   :  { %920 = vsyncpa [#allocation12], 1 }
 0x49a   :  { %921 = vsyncpa [#allocation4], 1 }

</bundles_post_ra>
